<compile_context>
chip_gen: v7x
topology: tpu7x:2x2x1
jax: 0.10.0
libtpu: 0.0.40
codegen_flags: <defaults>
</compile_context>

<pallas_src>
import functools

import jax
import jax.numpy as jnp
from jax.experimental import pallas as pl
from jax.experimental.pallas import tpu as pltpu


def _round_up(x, m):
    return ((x + m - 1) // m) * m


def _pick_tile(dim_padded, multiple, cap):
    """Largest multiple of `multiple` that divides dim_padded and is <= cap."""
    best = multiple
    t = multiple
    limit = min(cap, dim_padded)
    while t <= limit:
        if dim_padded % t == 0:
            best = t
        t += multiple
    return best


def _split_for_megacore(Bp, TM, Coutp, TN):
    """If the M/N grid would be 1x1, split one parallel axis (v7x 2-TC)."""
    if Bp // TM > 1 or Coutp // TN > 1:
        return TM, TN
    if Coutp >= 256:
        return TM, _pick_tile(Coutp, 128, Coutp // 2)
    if Bp >= 32:
        return _pick_tile(Bp, 16, Bp // 2), TN
    return TM, TN


# --------------------------------------------------------------------------
# Kernels (P1 tiled matmul + P3 accumulator init/finalize)
# --------------------------------------------------------------------------

def _fc_kernel_bias(x_ref, wt_ref, b_ref, o_ref, acc_ref, *, neg_slope):
    k = pl.program_id(2)

    @pl.when(k == 0)
    def _():
        acc_ref[...] = jnp.zeros_like(acc_ref)

    acc_ref[...] += jnp.dot(x_ref[...], wt_ref[...],
                            preferred_element_type=jnp.float32)

    @pl.when(k == pl.num_programs(2) - 1)
    def _():
        acc = acc_ref[...] + b_ref[...]            # bias already scaled (f32)
        out = jnp.where(acc >= 0, acc, acc * jnp.float32(neg_slope))
        o_ref[...] = out.astype(o_ref.dtype)


def _fc_kernel_nobias(x_ref, wt_ref, o_ref, acc_ref, *, neg_slope):
    k = pl.program_id(2)

    @pl.when(k == 0)
    def _():
        acc_ref[...] = jnp.zeros_like(acc_ref)

    acc_ref[...] += jnp.dot(x_ref[...], wt_ref[...],
                            preferred_element_type=jnp.float32)

    @pl.when(k == pl.num_programs(2) - 1)
    def _():
        acc = acc_ref[...]
        out = jnp.where(acc >= 0, acc, acc * jnp.float32(neg_slope))
        o_ref[...] = out.astype(o_ref.dtype)


# --------------------------------------------------------------------------
# Parameter init: fold lr-multipliers, transpose, pad and cast ONCE.
# --------------------------------------------------------------------------

def init_fc_params(key, in_channels, out_channels, gain=2 ** 0.5,
                   use_wscale=False, lrmul=1.0, bias=True,
                   tn_cap=1024, tk_cap=1024):
    """Matches FC.__init__ (torch.randn(Cout, Cin) * init_std, bias zeros)."""
    he_std = gain * in_channels ** (-0.5)
    if use_wscale:
        init_std = 1.0 / lrmul
        w_lrmul = he_std * lrmul
    else:
        init_std = he_std / lrmul
        w_lrmul = lrmul
    weight = jax.random.normal(
        key, (out_channels, in_channels), jnp.float32) * init_std

    Cin, Cout = in_channels, out_channels
    Cinp = _round_up(Cin, 128)
    Coutp = _round_up(Cout, 128)
    TK = _pick_tile(Cinp, 128, tk_cap)
    TN = _pick_tile(Coutp, 128, tn_cap)

    # Fold w_lrmul, transpose to (Cin, Cout), pad, cast to bf16 — once.
    wt = (weight * jnp.float32(w_lrmul)).T
    wt = jnp.pad(wt, ((0, Cinp - Cin), (0, Coutp - Cout)))
    wt = wt.astype(jnp.bfloat16)

    if bias:
        b_lrmul = lrmul
        bias_raw = jnp.zeros((Cout,), jnp.float32)
        b_folded = (bias_raw * jnp.float32(b_lrmul)).reshape(1, Cout)
        b_folded = jnp.pad(b_folded, ((0, 0), (0, Coutp - Cout)))
    else:
        b_lrmul = 0.0
        bias_raw = None
        b_folded = None

    return {
        "weight": weight, "bias_raw": bias_raw,
        "w_lrmul": w_lrmul, "b_lrmul": b_lrmul,
        "wt": wt, "bias": b_folded,
        "Cin": Cin, "Cout": Cout, "TK": TK, "TN": TN,
    }


# --------------------------------------------------------------------------
# Forward wrapper
# --------------------------------------------------------------------------

def fc_forward(x, params):
    """x: (B, Cin) f32 (cast to bf16 internally; f32 accumulate)."""
    B, Cin = x.shape
    assert Cin == params["Cin"]
    Cout = params["Cout"]
    wt = params["wt"]
    bias = params["bias"]
    Cinp, Coutp = wt.shape
    TK, TN = params["TK"], params["TN"]

    Bp = _round_up(B, 16)                 # bf16 sublane packing -> 16
    TM = _pick_tile(Bp, 16, 512)
    TM, TN = _split_for_megacore(Bp, TM, Coutp, TN)

    xb = x.astype(jnp.bfloat16)
    if (Bp, Cinp) != (B, Cin):
        xb = jnp.pad(xb, ((0, Bp - B), (0, Cinp - Cin)))

    grid = (Bp // TM, Coutp // TN, Cinp // TK)

    out_dtype = x.dtype
    flops = 2 * Bp * Cinp * Coutp
    bytes_accessed = (Bp * Cinp * 2                       # x (bf16)
                      + Cinp * Coutp * 2                  # weight (bf16)
                      + Bp * Coutp * jnp.dtype(out_dtype).itemsize)
    if bias is not None:
        bytes_accessed += Coutp * 4

    if bias is not None:
        kernel = functools.partial(_fc_kernel_bias, neg_slope=0.2)
        in_specs = [
            pl.BlockSpec((TM, TK), lambda i, j, k: (i, k)),
            pl.BlockSpec((TK, TN), lambda i, j, k: (k, j)),
            pl.BlockSpec((1, TN), lambda i, j, k: (0, j)),
        ]
        args = (xb, wt, bias)
    else:
        kernel = functools.partial(_fc_kernel_nobias, neg_slope=0.2)
        in_specs = [
            pl.BlockSpec((TM, TK), lambda i, j, k: (i, k)),
            pl.BlockSpec((TK, TN), lambda i, j, k: (k, j)),
        ]
        args = (xb, wt)

    out = pl.pallas_call(
        kernel,
        out_shape=jax.ShapeDtypeStruct((Bp, Coutp), out_dtype),
        grid_spec=pltpu.PrefetchScalarGridSpec(
            num_scalar_prefetch=0,
            grid=grid,
            in_specs=in_specs,
            out_specs=pl.BlockSpec((TM, TN), lambda i, j, k: (i, j)),
            scratch_shapes=[pltpu.VMEM((TM, TN), jnp.float32)],
        ),
        compiler_params=pltpu.CompilerParams(
            dimension_semantics=("parallel", "parallel", "arbitrary"),
            vmem_limit_bytes=32 * 1024 * 1024,
        ),
        cost_estimate=pl.CostEstimate(
            flops=flops, transcendentals=0, bytes_accessed=bytes_accessed),
    )(*args)

    if (Bp, Coutp) != (B, Cout):
        out = out[:B, :Cout]
    return out


# --------------------------------------------------------------------------
# Reference + tests
# --------------------------------------------------------------------------

def _reference(x, params):
    """Same math as the kernel (bf16 operands, f32 accumulate)."""
    w_eff = params["weight"] * jnp.float32(params["w_lrmul"])      # (Cout, Cin)
    xb = x.astype(jnp.bfloat16).astype(jnp.float32)
    wb = w_eff.T.astype(jnp.bfloat16).astype(jnp.float32)          # (Cin, Cout)
    out = jnp.dot(xb, wb, precision=jax.lax.Precision.HIGHEST)
    if params["bias_raw"] is not None:
        out = out + params["bias_raw"] * jnp.float32(params["b_lrmul"])
    return jnp.where(out >= 0, out, 0.2 * out)


if __name__ == "__main__":
    key = jax.random.PRNGKey(0)
    k_x, k_w, k_x2, k_w2 = jax.random.split(key, 4)

    # --- test 1: small shape, bias path -----------------------------------
    B, Cin, Cout = 8, 32, 64
    x = jax.random.normal(k_x, (B, Cin), jnp.float32)
    params = init_fc_params(k_w, Cin, Cout, gain=2 ** 0.5,
                            use_wscale=False, lrmul=1.0, bias=True)
    out = fc_forward(x, params)
    jax.block_until_ready(out)
    assert out.shape == (B, Cout)
    ref = _reference(x, params)
    assert jnp.allclose(out, ref, atol=1e-4, rtol=1e-4)
    # sanity vs. the full-f32 PyTorch math (bf16 weights => loose tolerance)
    ref_f32 = x @ (params["weight"] * params["w_lrmul"]).T \
        + params["bias_raw"] * params["b_lrmul"]
    ref_f32 = jnp.where(ref_f32 >= 0, ref_f32, 0.2 * ref_f32)
    assert jnp.allclose(out, ref_f32, atol=5e-2, rtol=5e-2)

    # --- test 2: no-bias path ----------------------------------------------
    params_nb = init_fc_params(k_w, Cin, Cout, gain=2 ** 0.5,
                               use_wscale=False, lrmul=1.0, bias=False)
    out_nb = fc_forward(x, params_nb)
    jax.block_until_ready(out_nb)
    ref_nb = _reference(x, params_nb)
    assert jnp.allclose(out_nb, ref_nb, atol=1e-4, rtol=1e-4)

    # --- test 3: multi-tile K + megacore N split (odd shapes) ---------------
    B2, Cin2, Cout2 = 24, 1200, 200
    x2 = jax.random.normal(k_x2, (B2, Cin2), jnp.float32)
    params2 = init_fc_params(k_w2, Cin2, Cout2, gain=2 ** 0.5,
                             use_wscale=True, lrmul=0.5, bias=True)
    out2 = fc_forward(x2, params2)
    jax.block_until_ready(out2)
    assert out2.shape == (B2, Cout2)
    ref2 = _reference(x2, params2)
    assert jnp.allclose(out2, ref2, atol=1e-3, rtol=1e-3)

    print("KERNEL_OK")
</pallas_src>

<mosaic_0001>
module attributes {stable_mosaic.version = 11 : i64} {
  func.func @_fc_kernel_bias(%arg0: i32, %arg1: i32, %arg2: i32, %arg3: memref<16x128xbf16, #tpu.memory_space<vmem>>, %arg4: memref<128x128xbf16, #tpu.memory_space<vmem>>, %arg5: memref<1x128xf32, #tpu.memory_space<vmem>>, %arg6: memref<16x128xf32, #tpu.memory_space<vmem>>, %arg7: memref<16x128xf32, #tpu.memory_space<vmem>>) attributes {dimension_semantics = [#tpu.dimension_semantics<parallel>, #tpu.dimension_semantics<parallel>, #tpu.dimension_semantics<arbitrary>], iteration_bounds = array<i64: 1, 1, 1>, scalar_prefetch = 0 : i64, scratch_operands = 1 : i64, tpu.core_type = #tpu.core_type<tc>, window_params = [{transform_indices = @transform_0, window_bounds = array<i64: 16, 128>}, {transform_indices = @transform_1, window_bounds = array<i64: 128, 128>}, {transform_indices = @transform_2, window_bounds = array<i64: 1, 128>}, {transform_indices = @transform_3, window_bounds = array<i64: 16, 128>}]} {
    %c0_i32 = arith.constant 0 : i32
    %0 = arith.cmpi eq, %arg2, %c0_i32 : i32
    %1 = arith.extui %0 : i1 to i32
    %c0_i32_0 = arith.constant 0 : i32
    %2 = arith.cmpi ne, %1, %c0_i32_0 : i32
    scf.if %2 {
      %cst_10 = arith.constant 0.000000e+00 : f32
      %12 = vector.broadcast %cst_10 : f32 to vector<16x128xf32>
      %c0_11 = arith.constant 0 : index
      %c0_12 = arith.constant 0 : index
      %13 = vector.load %arg7[%c0_11, %c0_12] : memref<16x128xf32, #tpu.memory_space<vmem>>, vector<16x128xf32>
      tpu.vector_store %arg7[%c0_11, %c0_12], %12 {strides = array<i32>} : memref<16x128xf32, #tpu.memory_space<vmem>>, vector<16x128xf32>,
    } else {
    }
    %c0 = arith.constant 0 : index
    %c0_1 = arith.constant 0 : index
    %3 = vector.load %arg7[%c0, %c0_1] : memref<16x128xf32, #tpu.memory_space<vmem>>, vector<16x128xf32>
    %c0_2 = arith.constant 0 : index
    %c0_3 = arith.constant 0 : index
    %4 = vector.load %arg3[%c0_2, %c0_3] : memref<16x128xbf16, #tpu.memory_space<vmem>>, vector<16x128xbf16>
    %c0_4 = arith.constant 0 : index
    %c0_5 = arith.constant 0 : index
    %5 = vector.load %arg4[%c0_4, %c0_5] : memref<128x128xbf16, #tpu.memory_space<vmem>>, vector<128x128xbf16>
    %cst = arith.constant dense<0.000000e+00> : vector<16x128xf32>
    %6 = tpu.matmul %4, %5, %cst {dimension_numbers = #tpu.dot_dimension_numbers<[1], [0], [0], [1], [0, 0, 1, 1], [], []>} : vector<16x128xbf16>, vector<128x128xbf16>, vector<16x128xf32> -> vector<16x128xf32>
    %7 = arith.addf %3, %6 : vector<16x128xf32>
    %c0_6 = arith.constant 0 : index
    %c0_7 = arith.constant 0 : index
    %8 = vector.load %arg7[%c0_6, %c0_7] : memref<16x128xf32, #tpu.memory_space<vmem>>, vector<16x128xf32>
    tpu.vector_store %arg7[%c0_6, %c0_7], %7 {strides = array<i32>} : memref<16x128xf32, #tpu.memory_space<vmem>>, vector<16x128xf32>,
    %c0_i32_8 = arith.constant 0 : i32
    %9 = arith.cmpi eq, %arg2, %c0_i32_8 : i32
    %10 = arith.extui %9 : i1 to i32
    %c0_i32_9 = arith.constant 0 : i32
    %11 = arith.cmpi ne, %10, %c0_i32_9 : i32
    scf.if %11 {
      %c0_10 = arith.constant 0 : index
      %c0_11 = arith.constant 0 : index
      %12 = vector.load %arg7[%c0_10, %c0_11] : memref<16x128xf32, #tpu.memory_space<vmem>>, vector<16x128xf32>
      %c0_12 = arith.constant 0 : index
      %c0_13 = arith.constant 0 : index
      %13 = vector.load %arg5[%c0_12, %c0_13] : memref<1x128xf32, #tpu.memory_space<vmem>>, vector<1x128xf32>
      %14 = vector.broadcast %13 : vector<1x128xf32> to vector<16x128xf32>
      %15 = arith.addf %12, %14 : vector<16x128xf32>
      %cst_14 = arith.constant 0.000000e+00 : f32
      %16 = vector.broadcast %cst_14 : f32 to vector<16x128xf32>
      %17 = arith.cmpf oge, %15, %16 : vector<16x128xf32>
      %cst_15 = arith.constant 2.000000e-01 : f32
      %18 = vector.broadcast %cst_15 : f32 to vector<16x128xf32>
      %19 = arith.mulf %15, %18 : vector<16x128xf32>
      %20 = arith.select %17, %15, %19 : vector<16x128xi1>, vector<16x128xf32>
      %c0_16 = arith.constant 0 : index
      %c0_17 = arith.constant 0 : index
      %21 = vector.load %arg6[%c0_16, %c0_17] : memref<16x128xf32, #tpu.memory_space<vmem>>, vector<16x128xf32>
      tpu.vector_store %arg6[%c0_16, %c0_17], %20 {strides = array<i32>} : memref<16x128xf32, #tpu.memory_space<vmem>>, vector<16x128xf32>,
    } else {
    }
    return
  }
  func.func @transform_0(%arg0: i32, %arg1: i32, %arg2: i32) -> (i32, i32) {
    %c0_i32 = arith.constant 0 : i32
    return %arg0, %arg2 : i32, i32
  }
  func.func @transform_1(%arg0: i32, %arg1: i32, %arg2: i32) -> (i32, i32) {
    %c0_i32 = arith.constant 0 : i32
    return %arg2, %arg1 : i32, i32
  }
  func.func @transform_2(%arg0: i32, %arg1: i32, %arg2: i32) -> (i32, i32) {
    %c0_i32 = arith.constant 0 : i32
    %c0_i32_0 = arith.constant 0 : i32
    return %c0_i32, %arg1 : i32, i32
  }
  func.func @transform_3(%arg0: i32, %arg1: i32, %arg2: i32) -> (i32, i32) {
    %c0_i32 = arith.constant 0 : i32
    return %arg0, %arg1 : i32, i32
  }
}

</mosaic_0001>

<bundles_post_ra>
// kernel: tpu_custom_call.1
= control target key start
LH: loop header
LB: loop body
LE: loop exit
PB: predicated region body
PF: predicated region fallthrough
CT: control target
= control target key end

     0   :  { %8 = vsyncpa [#allocation4], 0  ;;  %s406_s0 = inlined_call_operand.hbm [shape: bf16[16,128], index: 0, kind: input, shape index: {}]   ;;  %s407_s1 = inlined_call_operand.hbm [shape: bf16[128,128], index: 1, kind: input, shape index: {}]   ;;  %s408_s2 = inlined_call_operand.vmem [shape: f32[1,128], index: 2, kind: input, shape index: {}]   ;;  %s409_s3 = inlined_call_operand.hbm [shape: f32[16,128], index: 3, kind: output, shape index: {}]  }
   0x1   :  { %9 = vsyncpa [#allocation7], 0 }
   0x2   :  { %10 = vsyncpa [#allocation5], 0  ;;  %s338_s12 = smov [#allocation3]   ;;  %s266_s16 = scalar_lea.hbm %s406_s0, 128 }
   0x3   :  { %s16_s13 = sshll.u32 %s338_s12, 4  ;;  %p267_p0 = scmp.ne.s32.totalorder %s406_s0, %s266_s16  ;;  %s17_s13 = int_to_ptr.vmem [resolvable:$true] %s16_s13 }
   0x4   :  { %p270_p1 = scmp.lt.u32.totalorder %s266_s16, %s406_s0 }
   0x6   :  { %p272_p2 = pnand %p270_p1, %p267_p0 }
   0x8   :  { %275 = shalt.err (!%p272_p2)
}
   0x9   :  { %s276_s21 = scalar_lea.vmem %s17_s13, 128  ;;  %p281_p4 = scmp.lt.s32.totalorder %s17_s13, %s17_s13 }
   0xa   :  { %p277_p3 = scmp.ne.s32.totalorder %s17_s13, %s276_s21  ;;  %p282_p5 = scmp.lt.s32.totalorder %s276_s21, %s276_s21 }
   0xc   :  { %p283_p6 = por %p282_p5, %p281_p4 }
   0xe   :  { %p284_p7 = pnand %p283_p6, %p277_p3 }
  0x10   :  { %287 = shalt.err (!%p284_p7)
}
  0x11   :  { %s339_s22 = smov 64   ;;  %s340_s23 = smov 4  }
  0x12   :  { %22 = dma.hbm_to_vmem [thread:$0]  %s406_s0, 128, %s17_s13, [#allocation4], %s339_s22, %s339_s22, %s340_s23  }
  0x13   :  { %s341_s26 = smov [#allocation6]   ;;  %s288_s30 = scalar_lea.hbm %s407_s1, 1024 }
  0x14   :  { %s28_s27 = sshll.u32 %s341_s26, 4  ;;  %p289_p8 = scmp.ne.s32.totalorder %s407_s1, %s288_s30  ;;  %s29_s27 = int_to_ptr.vmem [resolvable:$true] %s28_s27 }
  0x15   :  { %p292_p9 = scmp.lt.u32.totalorder %s288_s30, %s407_s1 }
  0x17   :  { %p294_p10 = pnand %p292_p9, %p289_p8 }
  0x19   :  { %297 = shalt.err (!%p294_p10)
}
  0x1a   :  { %s298_s8 = scalar_lea.vmem %s29_s27, 1024  ;;  %p303_p12 = scmp.lt.s32.totalorder %s29_s27, %s29_s27 }
  0x1b   :  { %p299_p11 = scmp.ne.s32.totalorder %s29_s27, %s298_s8  ;;  %p304_p13 = scmp.lt.s32.totalorder %s298_s8, %s298_s8 }
  0x1d   :  { %p305_p0 = por %p304_p13, %p303_p12 }
  0x1f   :  { %p306_p1 = pnand %p305_p0, %p299_p11 }
  0x21   :  { %309 = shalt.err (!%p306_p1)
}
  0x22   :  { %34 = dma.hbm_to_vmem [thread:$0]  %s407_s1, 1024, %s29_s27, [#allocation7], %s339_s22, %s339_s22, %s340_s23  }
  0x23   :  { %332 = dma.done.wait [#allocation4], 128  }
  0x24   :  { %333 = vsyncadd [#allocation4], 4294967168 }
  0x25   :  { %334 = dma.done.wait [#allocation7], 1024  }
  0x26   :  { %335 = vsyncadd [#allocation7], 4294966272  ;;  %v342_v0 = vmov 0.0   ;;  %vm343_vm0 = vmmov 0   ;;  %v257_v1 = vld [vmem:[#allocation6] sm:$0xff]   ;;  %v258_v2 = vld [vmem:[#allocation6 + $0x8] sm:$0xff]  }
  0x27   :  { %228 = vmatprep.subr.bf16.mxu0 %v342_v0  ;;  %244 = vmatprep.mubr.msk.bf16.mxu0 %vm343_vm0, %v342_v0  ;;  %v259_v3 = vld [vmem:[#allocation6 + $0x10] sm:$0xff]   ;;  %v260_v4 = vld [vmem:[#allocation6 + $0x18] sm:$0xff]   ;;  %v261_v5 = vld [vmem:[#allocation6 + $0x20] sm:$0xff]   ;;  %s344_s11 = smov [#allocation8]  }
  0x28   :  { %229 = vmatpush3.bf16.msra.mxu0 %v257_v1  ;;  %v262_v6 = vld [vmem:[#allocation6 + $0x28] sm:$0xff]   ;;  %v263_v7 = vld [vmem:[#allocation6 + $0x30] sm:$0xff]   ;;  %v264_v8 = vld [vmem:[#allocation6 + $0x38] sm:$0xff]   ;;  %s196_s12 = sshll.u32 %s344_s11, 4  ;;  %s197_s12 = int_to_ptr.vmem [resolvable:$true] %s196_s12 }
  0x29   :  { %230 = vmatprep.subr.bf16.mxu0 %v342_v0  ;;  %v265_v9 = vld [vmem:[#allocation3] sm:$0xff]   ;;  %s310_s13 = scalar_lea.vmem %s197_s12, 256  ;;  %p315_p3 = scmp.lt.s32.totalorder %s197_s12, %s197_s12 }
  0x2a   :  { %v218_v10 = vld [vmem:[%s408_s2] ss:$0 sm:$0xff]  ;;  %p311_p2 = scmp.ne.s32.totalorder %s197_s12, %s310_s13  ;;  %p316_p4 = scmp.lt.s32.totalorder %s310_s13, %s310_s13 }
  0x2c   :  { %231 = vmatpush3.bf16.msra.mxu0 %v258_v2  ;;  %p317_p5 = por %p316_p4, %p315_p3 }
  0x2d   :  { %232 = vmatprep.subr.bf16.mxu0 %v342_v0 }
  0x2e   :  { %p318_p6 = pnand %p317_p5, %p311_p2 }
  0x30   :  { %233 = vmatpush3.bf16.msra.mxu0 %v259_v3 }
  0x31   :  { %234 = vmatprep.subr.bf16.mxu0 %v342_v0 }
  0x34   :  { %235 = vmatpush3.bf16.msra.mxu0 %v260_v4 }
  0x35   :  { %236 = vmatprep.subr.bf16.mxu0 %v342_v0 }
  0x38   :  { %237 = vmatpush3.bf16.msra.mxu0 %v261_v5 }
  0x39   :  { %238 = vmatprep.subr.bf16.mxu0 %v342_v0 }
  0x3c   :  { %239 = vmatpush3.bf16.msra.mxu0 %v262_v6 }
  0x3d   :  { %240 = vmatprep.subr.bf16.mxu0 %v342_v0 }
  0x40   :  { %241 = vmatpush3.bf16.msra.mxu0 %v263_v7 }
  0x41   :  { %242 = vmatprep.subr.bf16.mxu0 %v342_v0 }
  0x44   :  { %243 = vmatpush3.bf16.msra.mxu0 %v264_v8 }
  0x47   :  { %245 = vmatmul.mubr.bf16.vlgmr.msra.gmra.mrb[0].mxu0 %v265_v9 }
 0x11a   :  { %v158_v11 = vpop.f32.mrb[0].mxu0 }
 0x11b   :  { %v181_v12 = vadd.f32 %v218_v10, %v158_v11  ;;  %v246_v13 = vpop.f32.mrb[1].mxu0 }
 0x11c   :  { %v161_v14 = vpop.f32.mrb[2].mxu0 }
 0x11d   :  { %vm183_vm1 = vcmp.ge.f32.partialorder %v181_v12, 0.0  ;;  %v185_v15 = vmul.f32 0.2, %v181_v12  ;;  %v182_v16 = vadd.f32 %v218_v10, %v161_v14  ;;  %v247_v17 = vpop.f32.mrb[3].mxu0 }
 0x11f   :  { %v187_v18 = vsel %vm183_vm1, %v181_v12, %v185_v15  ;;  %vm184_vm2 = vcmp.ge.f32.partialorder %v182_v16, 0.0  ;;  %v186_v19 = vmul.f32 0.2, %v182_v16 }
 0x120   :  { %189 = vst [vmem:[#allocation8] sm:$0xff] %v187_v18 }
 0x121   :  { %v188_v20 = vsel %vm184_vm2, %v182_v16, %v186_v19 }
 0x122   :  { %190 = vst [vmem:[#allocation8 + $0x8] sm:$0xff] %v188_v20 }
 0x123   :  { %321 = shalt.err (!%p318_p6)
}
 0x124   :  { %s322_s15 = scalar_lea.hbm %s409_s3, 256 }
 0x125   :  { %p323_p7 = scmp.ne.s32.totalorder %s409_s3, %s322_s15  ;;  %p326_p8 = scmp.lt.u32.totalorder %s322_s15, %s409_s3 }
 0x127   :  { %p328_p9 = pnand %p326_p8, %p323_p7 }
 0x129   :  { %331 = shalt.err (!%p328_p9)
}
 0x12a   :  { %s345_s20 = smov 128   ;;  %s346_s21 = smov 8  }
 0x12b   :  { %202 = dma.vmem_to_hbm [thread:$0]  %s197_s12, 256, %s409_s3, [#allocation5], %s345_s20, %s345_s20, %s346_s21  }
 0x12c   :  { %336 = dma.done.wait [#allocation5], 256  }
 0x12d   :  { %337 = vsyncadd [#allocation5], 4294967040 }
 0x12e   :  { %206 = vsyncpa [#allocation4], 1 }
 0x12f   :  { %207 = vsyncpa [#allocation7], 1 }
 0x130   :  { %208 = vsyncpa [#allocation5], 1 }

</bundles_post_ra>
